<compile_context>
chip_gen: v5e
topology: v5e:2x2
jax: 0.10.0
libtpu: 0.0.40
codegen_flags: <defaults>
</compile_context>

<pallas_src>
import jax
import jax.numpy as jnp
from jax.experimental import pallas as pl
from jax.experimental.pallas import tpu as pltpu

LANE = 128
_COMPUTE_DTYPE = jnp.bfloat16  # MXU operand dtype (f32 accumulate everywhere)


def _round_up(x, m):
    return ((x + m - 1) // m) * m


# ---------------------------------------------------------------------------
# Kernels
# ---------------------------------------------------------------------------
def _mlp_small_kernel(x_ref, gw_ref, uw_ref, dw_ref, o_ref):
    """Decode / tiny-M path: whole problem resident in VMEM, no grid."""
    x = x_ref[...]                                                    # bf16 [M, H]
    g = jnp.dot(x, gw_ref[...], preferred_element_type=jnp.float32)  # f32 [M, Ip]
    u = jnp.dot(x, uw_ref[...], preferred_element_type=jnp.float32)  # f32 [M, Ip]
    h = (g / (1.0 + jnp.exp(-g))) * u                                 # SiLU(g)*up in f32
    o_ref[...] = jnp.dot(h.astype(_COMPUTE_DTYPE), dw_ref[...],
                         preferred_element_type=jnp.float32).astype(o_ref.dtype)


def _mlp_tiled_kernel(x_ref, gw_ref, uw_ref, dw_ref, o_ref, acc_ref):
    """Prefill path: grid = (M tiles, I chunks); accumulate down-proj in f32."""
    k = pl.program_id(1)

    @pl.when(k == 0)
    def _():
        acc_ref[...] = jnp.zeros_like(acc_ref)

    x = x_ref[...]                                                    # bf16 [tm, H]
    g = jnp.dot(x, gw_ref[...], preferred_element_type=jnp.float32)  # f32 [tm, tk]
    u = jnp.dot(x, uw_ref[...], preferred_element_type=jnp.float32)
    h = (g / (1.0 + jnp.exp(-g))) * u                                 # f32 [tm, tk]
    acc_ref[...] += jnp.dot(h.astype(_COMPUTE_DTYPE), dw_ref[...],
                            preferred_element_type=jnp.float32)       # f32 [tm, Hp]

    @pl.when(k == pl.num_programs(1) - 1)
    def _():
        o_ref[...] = acc_ref[...].astype(o_ref.dtype)


# ---------------------------------------------------------------------------
# One-time weight preparation (call at weight-load time, NOT per forward)
# ---------------------------------------------------------------------------
def prepare_mlp_weights(gate_w, up_w, down_w):
    """bf16 cast + lane-align I (multiple of 128) + pad down output to 128 lanes.

    Zero padding is exact: padded gate/up columns yield h == 0, and the
    corresponding padded down-proj rows are zero, so they contribute nothing.
    gate_w/up_w: [H, I]; down_w: [I, H] (already transposed vs nn.Linear).
    """
    H, I = gate_w.shape
    Hp = _round_up(H, LANE)
    Ip = _round_up(I, LANE)
    gw = jnp.pad(gate_w, ((0, 0), (0, Ip - I))).astype(_COMPUTE_DTYPE)
    uw = jnp.pad(up_w, ((0, 0), (0, Ip - I))).astype(_COMPUTE_DTYPE)
    dw = jnp.pad(down_w, ((0, Ip - I), (0, Hp - H))).astype(_COMPUTE_DTYPE)
    return {"gate": gw, "up": uw, "down": dw, "H": H, "I": I, "Hp": Hp, "Ip": Ip}


# ---------------------------------------------------------------------------
# Forward
# ---------------------------------------------------------------------------
def mlp_pallas(x, params, *, tm=256):
    """x: [B, S, H] (any float dtype); params: output of prepare_mlp_weights."""
    B, S, H = x.shape
    assert H == params["H"], "hidden size mismatch"
    Hp, Ip = params["Hp"], params["Ip"]
    gw, uw, dw = params["gate"], params["up"], params["down"]
    out_dtype = x.dtype
    out_itemsize = jnp.dtype(out_dtype).itemsize

    M = B * S
    x2d = x.reshape(M, H).astype(_COMPUTE_DTYPE)

    weight_bytes = (gw.size + uw.size + dw.size) * 2                  # bf16
    act_bytes = M * H * 2 + M * Hp * out_itemsize
    interm_bytes = 3 * M * Ip * 4                                     # g, u, h in f32
    small_footprint = weight_bytes + act_bytes + interm_bytes
    use_small = (M <= 1024) and (small_footprint < (16 << 20))

    if use_small:
        vmem_limit = int(min(64 << 20, 2 * small_footprint + (4 << 20)))
        out2d = pl.pallas_call(
            _mlp_small_kernel,
            out_shape=jax.ShapeDtypeStruct((M, Hp), out_dtype),
            in_specs=[pl.BlockSpec(memory_space=pltpu.MemorySpace.VMEM)] * 4,
            out_specs=pl.BlockSpec(memory_space=pltpu.MemorySpace.VMEM),
            compiler_params=pltpu.CompilerParams(vmem_limit_bytes=vmem_limit),
        )(x2d, gw, uw, dw)
    else:
        # Streaming tiling: I-chunked accumulator; weights never fully resident.
        tk = 512 if Ip % 512 == 0 else (256 if Ip % 256 == 0 else 128)
        grid_m = pl.cdiv(M, tm)
        grid_k = Ip // tk
        # double-buffered bf16 tiles + f32 accumulator + headroom
        tile_bytes = (2 * (tm * H * 2 + 2 * H * tk * 2 + tk * Hp * 2
                           + tm * Hp * out_itemsize)
                      + tm * Hp * 4)
        vmem_limit = int(min(64 << 20, tile_bytes + (4 << 20)))
        out2d = pl.pallas_call(
            _mlp_tiled_kernel,
            out_shape=jax.ShapeDtypeStruct((M, Hp), out_dtype),
            grid_spec=pltpu.PrefetchScalarGridSpec(
                num_scalar_prefetch=0,
                grid=(grid_m, grid_k),
                in_specs=[
                    pl.BlockSpec((tm, H), lambda i, k: (i, 0)),   # x row tile
                    pl.BlockSpec((H, tk), lambda i, k: (0, k)),   # gate weight slab
                    pl.BlockSpec((H, tk), lambda i, k: (0, k)),   # up weight slab
                    pl.BlockSpec((tk, Hp), lambda i, k: (k, 0)),  # down weight slab
                ],
                out_specs=pl.BlockSpec((tm, Hp), lambda i, k: (i, 0)),
                scratch_shapes=[pltpu.VMEM((tm, Hp), jnp.float32)],
            ),
            compiler_params=pltpu.CompilerParams(
                dimension_semantics=("parallel", "arbitrary"),
                vmem_limit_bytes=vmem_limit),
        )(x2d, gw, uw, dw)

    if Hp != H:
        out2d = out2d[:, :H]
    return out2d.reshape(B, S, H)


# ---------------------------------------------------------------------------
# Reference (same bf16 operand rounding, f32 accumulate)
# ---------------------------------------------------------------------------
def mlp_reference_bf16(x2d, gate_w, up_w, down_w):
    xb = x2d.astype(jnp.bfloat16)
    g = jnp.dot(xb, gate_w.astype(jnp.bfloat16), preferred_element_type=jnp.float32)
    u = jnp.dot(xb, up_w.astype(jnp.bfloat16), preferred_element_type=jnp.float32)
    h = (g * jax.nn.sigmoid(g)) * u
    return jnp.dot(h.astype(jnp.bfloat16), down_w.astype(jnp.bfloat16),
                   preferred_element_type=jnp.float32)


if __name__ == "__main__":
    B, S, H, I = 2, 8, 32, 64  # batch, seq, hidden_size, intermediate_size

    key = jax.random.PRNGKey(0)
    kx, kg, ku, kd = jax.random.split(key, 4)

    # Deterministic param init (uniform, like nn.Linear fan-in scaling).
    x = jax.random.normal(kx, (B, S, H), dtype=jnp.float32)
    gate_w = jax.random.uniform(kg, (H, I), jnp.float32, -1.0, 1.0) / jnp.sqrt(H)
    up_w = jax.random.uniform(ku, (H, I), jnp.float32, -1.0, 1.0) / jnp.sqrt(H)
    down_w = jax.random.uniform(kd, (I, H), jnp.float32, -1.0, 1.0) / jnp.sqrt(I)
    # TODO(synk): config.mlp_bias assumed False (LLaMA default); bias add omitted.

    params = prepare_mlp_weights(gate_w, up_w, down_w)  # once, at load time

    out = mlp_pallas(x, params)
    out = jax.block_until_ready(out)

    ref = mlp_reference_bf16(x.reshape(-1, H), gate_w, up_w, down_w).reshape(B, S, H)
    assert out.shape == (B, S, H)
    assert jnp.allclose(out, ref.astype(out.dtype), atol=5e-3, rtol=5e-3), \
        "mismatch vs reference"

    print("KERNEL_OK")
</pallas_src>

<mosaic_0001>
module attributes {stable_mosaic.version = 11 : i64} {
  func.func @_mlp_small_kernel(%arg0: memref<16x32xbf16, #tpu.memory_space<vmem>>, %arg1: memref<32x128xbf16, #tpu.memory_space<vmem>>, %arg2: memref<32x128xbf16, #tpu.memory_space<vmem>>, %arg3: memref<128x128xbf16, #tpu.memory_space<vmem>>, %arg4: memref<16x128xf32, #tpu.memory_space<vmem>>) attributes {dimension_semantics = [], scalar_prefetch = 0 : i64, scratch_operands = 0 : i64, tpu.core_type = #tpu.core_type<tc>} {
    %c0 = arith.constant 0 : index
    %c0_0 = arith.constant 0 : index
    %0 = vector.load %arg0[%c0, %c0_0] : memref<16x32xbf16, #tpu.memory_space<vmem>>, vector<16x32xbf16>
    %c0_1 = arith.constant 0 : index
    %c0_2 = arith.constant 0 : index
    %1 = vector.load %arg1[%c0_1, %c0_2] : memref<32x128xbf16, #tpu.memory_space<vmem>>, vector<32x128xbf16>
    %cst = arith.constant dense<0.000000e+00> : vector<16x128xf32>
    %2 = tpu.matmul %0, %1, %cst {dimension_numbers = #tpu.dot_dimension_numbers<[1], [0], [0], [1], [0, 0, 1, 1], [], []>} : vector<16x32xbf16>, vector<32x128xbf16>, vector<16x128xf32> -> vector<16x128xf32>
    %c0_3 = arith.constant 0 : index
    %c0_4 = arith.constant 0 : index
    %3 = vector.load %arg2[%c0_3, %c0_4] : memref<32x128xbf16, #tpu.memory_space<vmem>>, vector<32x128xbf16>
    %cst_5 = arith.constant dense<0.000000e+00> : vector<16x128xf32>
    %4 = tpu.matmul %0, %3, %cst_5 {dimension_numbers = #tpu.dot_dimension_numbers<[1], [0], [0], [1], [0, 0, 1, 1], [], []>} : vector<16x32xbf16>, vector<32x128xbf16>, vector<16x128xf32> -> vector<16x128xf32>
    %cst_6 = arith.constant 0.000000e+00 : f32
    %5 = vector.broadcast %cst_6 : f32 to vector<16x128xf32>
    %6 = arith.subf %5, %2 : vector<16x128xf32>
    %7 = math.exp %6 : vector<16x128xf32>
    %cst_7 = arith.constant 1.000000e+00 : f32
    %8 = vector.broadcast %cst_7 : f32 to vector<16x128xf32>
    %9 = arith.addf %8, %7 : vector<16x128xf32>
    %10 = arith.divf %2, %9 : vector<16x128xf32>
    %11 = arith.mulf %10, %4 : vector<16x128xf32>
    %12 = arith.truncf %11 : vector<16x128xf32> to vector<16x128xbf16>
    %c0_8 = arith.constant 0 : index
    %c0_9 = arith.constant 0 : index
    %13 = vector.load %arg3[%c0_8, %c0_9] : memref<128x128xbf16, #tpu.memory_space<vmem>>, vector<128x128xbf16>
    %cst_10 = arith.constant dense<0.000000e+00> : vector<16x128xf32>
    %14 = tpu.matmul %12, %13, %cst_10 {dimension_numbers = #tpu.dot_dimension_numbers<[1], [0], [0], [1], [0, 0, 1, 1], [], []>} : vector<16x128xbf16>, vector<128x128xbf16>, vector<16x128xf32> -> vector<16x128xf32>
    %c0_11 = arith.constant 0 : index
    %c0_12 = arith.constant 0 : index
    %15 = vector.load %arg4[%c0_11, %c0_12] : memref<16x128xf32, #tpu.memory_space<vmem>>, vector<16x128xf32>
    tpu.vector_store %arg4[%c0_11, %c0_12], %14 {strides = array<i32>} : memref<16x128xf32, #tpu.memory_space<vmem>>, vector<16x128xf32>,
    return
  }
}

</mosaic_0001>

<bundles_post_ra>
// kernel: tpu_custom_call.1
= control target key start
LH: loop header
LB: loop body
LE: loop exit
PB: predicated region body
PF: predicated region fallthrough
CT: control target
= control target key end

     0   :  { %9 = vsyncpa [#allocation3], 0  ;;  %s556_s0 = inlined_call_operand.hbm [shape: bf16[16,32], index: 0, kind: input, shape index: {}]   ;;  %s557_s1 = inlined_call_operand.hbm [shape: bf16[32,128], index: 1, kind: input, shape index: {}]   ;;  %s558_s2 = inlined_call_operand.hbm [shape: bf16[32,128], index: 2, kind: input, shape index: {}]   ;;  %s559_s3 = inlined_call_operand.hbm [shape: bf16[128,128], index: 3, kind: input, shape index: {}]   ;;  %s560_s4 = inlined_call_operand.hbm [shape: f32[16,128], index: 4, kind: output, shape index: {}]  }
   0x1   :  { %10 = vsyncpa [#allocation6], 0 }
   0x2   :  { %11 = vsyncpa [#allocation9], 0 }
   0x3   :  { %12 = vsyncpa [#allocation4], 0  ;;  %s30_s17 = sshll.u32 %s557_s1, 4  ;;  %s507_s18 = smov [#allocation5]   ;;  %s31_s17 = int_to_ptr.hbm [resolvable:$true] %s30_s17 }
   0x4   :  { %s32_s19 = sshll.u32 %s507_s18, 4  ;;  %s17_s22 = sshll.u32 %s556_s0, 4  ;;  %s33_s19 = int_to_ptr.vmem [resolvable:$true] %s32_s19  ;;  %s18_s22 = int_to_ptr.hbm [resolvable:$true] %s17_s22 }
   0x5   :  { %s508_s23 = smov 64   ;;  %s509_s24 = smov 4  }
   0x6   :  { %38 = dma.hbm_to_vmem [thread:$0]  %s31_s17, 256, %s33_s19, [#allocation6], %s508_s23, %s508_s23, %s509_s24  }
   0x7   :  { %s510_s25 = smov [#allocation2]   ;;  %s43_s29 = sshll.u32 %s558_s2, 4  ;;  %s44_s29 = int_to_ptr.hbm [resolvable:$true] %s43_s29 }
   0x8   :  { %s19_s26 = sshll.u32 %s510_s25, 4  ;;  %s56_s5 = sshll.u32 %s559_s3, 4  ;;  %s20_s26 = int_to_ptr.vmem [resolvable:$true] %s19_s26  ;;  %s57_s5 = int_to_ptr.hbm [resolvable:$true] %s56_s5 }
   0x9   :  { %25 = dma.hbm_to_vmem [thread:$0]  %s18_s22, 128, %s20_s26, [#allocation3], %s508_s23, %s508_s23, %s509_s24  }
   0xa   :  { %s511_s6 = smov [#allocation7]   ;;  %s512_s0 = smov [#allocation8]  }
   0xb   :  { %s45_s7 = sshll.u32 %s511_s6, 4  ;;  %s58_s8 = sshll.u32 %s512_s0, 4  ;;  %s46_s7 = int_to_ptr.vmem [resolvable:$true] %s45_s7  ;;  %s59_s8 = int_to_ptr.vmem [resolvable:$true] %s58_s8 }
   0xc   :  { %51 = dma.hbm_to_vmem [thread:$0]  %s44_s29, 256, %s46_s7, [#allocation6], %s508_s23, %s508_s23, %s509_s24  }
   0xd   :  { %64 = dma.hbm_to_vmem [thread:$0]  %s57_s5, 1024, %s59_s8, [#allocation9], %s508_s23, %s508_s23, %s509_s24  }
   0xe   :  { %499 = dma.done.wait [#allocation3], 128  }
   0xf   :  { %500 = vsyncadd [#allocation3], 4294967168 }
  0x10   :  { %501 = dma.done.wait [#allocation6], 512  }
  0x11   :  { %502 = vsyncadd [#allocation6], 4294966784 }
  0x12   :  { %503 = dma.done.wait [#allocation9], 1024  }
  0x13   :  { %504 = vsyncadd [#allocation9], 4294966272  ;;  %v351_v0 = vld [vmem:[#allocation5 + $0x8] sm:$0xff]  ;;  %v353_v1 = vld [vmem:[#allocation7 + $0x8] sm:$0xff]  ;;  %vm105_vm0 = vcmask 261120   ;;  %s513_s2 = smov [#allocation10]  }
  0x14   :  { %115 = vmatpush.bf16.msra.mxu0 %v351_v0  ;;  %v350_v2 = vld [vmem:[#allocation5] sm:$0xff]  ;;  %145 = vmatpush.bf16.msra.mxu1 %v353_v1  ;;  %v352_v3 = vld [vmem:[#allocation7] sm:$0xff]  ;;  %v349_v4 = vld [vmem:[#allocation2] sm:$0xff]  ;;  %s278_s3 = sshll.u32 %s513_s2, 4  ;;  %s280_s11 = sshll.u32 %s560_s4, 4  ;;  %s279_s3 = int_to_ptr.vmem [resolvable:$true] %s278_s3  ;;  %s281_s11 = int_to_ptr.hbm [resolvable:$true] %s280_s11 }
  0x15   :  { %v361_v5 = vld [vmem:[#allocation8 + $0x38] sm:$0xff]  ;;  %v360_v6 = vld [vmem:[#allocation8 + $0x30] sm:$0xff]  ;;  %v359_v7 = vld [vmem:[#allocation8 + $0x28] sm:$0xff]  ;;  %s514_s12 = smov 128   ;;  %s515_s13 = smov 8  }
  0x16   :  { %258 = vmatpush.bf16.msra.mxu2 %v361_v5  ;;  %v358_v8 = vld [vmem:[#allocation8 + $0x20] sm:$0xff]  ;;  %v357_v9 = vld [vmem:[#allocation8 + $0x18] sm:$0xff]  ;;  %v356_v11 = vld [vmem:[#allocation8 + $0x10] sm:$0xff] }
  0x17   :  { %v355_v14 = vld [vmem:[#allocation8 + $0x8] sm:$0xff]  ;;  %v354_v16 = vld [vmem:[#allocation8] sm:$0xff] }
  0x18   :  { %116 = vmatpush.bf16.msra.mxu0 %v350_v2  ;;  %146 = vmatpush.bf16.msra.mxu1 %v352_v3 }
  0x1a   :  { %259 = vmatpush.bf16.msra.mxu2 %v360_v6 }
  0x1b   :  { %307 = vmatmul.msk.bf16.vlgmr.msra.gmra.mxu0 %vm105_vm0, %v349_v4  ;;  %316 = vmatmul.msk.bf16.vlgmr.msra.gmra.mxu1 %vm105_vm0, %v349_v4 }
  0x1e   :  { %260 = vmatpush.bf16.msra.mxu2 %v359_v7 }
  0x22   :  { %261 = vmatpush.bf16.msra.mxu2 %v358_v8 }
  0x26   :  { %262 = vmatpush.bf16.msra.mxu2 %v357_v9 }
  0x2a   :  { %263 = vmatpush.bf16.msra.mxu2 %v356_v11 }
  0x2e   :  { %264 = vmatpush.bf16.msra.mxu2 %v355_v14 }
  0x32   :  { %265 = vmatpush.bf16.msra.mxu2 %v354_v16 }
  0x98   :  { %v118_v10 = vpop.f32.mrf.mxu0  ;;  %v148_v32 = vpop.f32.mrf.mxu1 }
  0x99   :  { %v153_v12 = vsub.f32 0.0, %v118_v10 }
  0x9b   :  { %v155_v13 = vmul.f32 1.442695, %v153_v12 }
  0x9d   :  { %371 = vpow2.f32 %v155_v13 }
  0xa0   :  { %v120_v15 = vpop.f32.mrf.mxu0  ;;  %v150_v46 = vpop.f32.mrf.mxu1 }
  0xa1   :  { %v154_v17 = vsub.f32 0.0, %v120_v15 }
  0xa3   :  { %v372_v18 = vpop.eup %371  ;;  %v157_v19 = vmul.f32 1.442695, %v154_v17 }
  0xa4   :  { %v159_v20 = vadd.f32 1.0, %v372_v18 }
  0xa5   :  { %373 = vpow2.f32 %v157_v19 }
  0xa6   :  { %375 = vrcp.f32 %v159_v20  ;;  %v172_v29 = vand.u32 2147483648, %v159_v20  ;;  %vm166_vm2 = vweird.f32 %v159_v20  ;;  %v170_v30 = vand.u32 2147483647, %v159_v20 }
  0xa8   :  { %v173_v35 = vor.u32 1.1754944e-38, %v172_v29  ;;  %vm171_vm4 = vcmp.eq.f32.partialorder %v170_v30, 8.507059e+37 }
  0xab   :  { %v374_v21 = vpop.eup %373 }
  0xac   :  { %v376_v22 = vpop.eup %375  ;;  %v160_v23 = vadd.f32 1.0, %v374_v21 }
  0xad   :  { %v162_v24 = vmul.f32 %v376_v22, %v159_v20  ;;  %vm167_vm1 = vweird.f32 %v376_v22 }
  0xae   :  { %377 = vrcp.f32 %v160_v23  ;;  %vm168_vm3 = vmor %vm166_vm2, %vm167_vm1  ;;  %v187_v36 = vand.u32 2147483648, %v160_v23  ;;  %v185_v38 = vand.u32 2147483647, %v160_v23  ;;  %vm181_vm6 = vweird.f32 %v160_v23 }
  0xaf   :  { %v163_v25 = vsub.f32 1.0, %v162_v24 }
  0xb0   :  { %v188_v41 = vor.u32 1.1754944e-38, %v187_v36  ;;  %vm186_vm8 = vcmp.eq.f32.partialorder %v185_v38, 8.507059e+37 }
  0xb1   :  { %v164_v26 = vmul.f32 %v376_v22, %v163_v25 }
  0xb3   :  { %v165_v27 = vadd.f32 %v376_v22, %v164_v26 }
  0xb4   :  { %v378_v28 = vpop.eup %377 }
  0xb5   :  { %v177_v31 = vmul.f32 %v378_v28, %v160_v23  ;;  %v169_v33 = vsel %vm168_vm3, %v376_v22, %v165_v27  ;;  %vm182_vm5 = vweird.f32 %v378_v28 }
  0xb6   :  { %v174_v39 = vsel %vm171_vm4, %v173_v35, %v169_v33  ;;  %vm183_vm7 = vmor %vm181_vm6, %vm182_vm5 }
  0xb7   :  { %v178_v34 = vsub.f32 1.0, %v177_v31  ;;  %v175_v42 = vmul.f32 %v174_v39, %v118_v10 }
  0xb9   :  { %v179_v37 = vmul.f32 %v378_v28, %v178_v34  ;;  %v191_v47 = vmul.f32 %v175_v42, %v148_v32 }
  0xbb   :  { %v180_v40 = vadd.f32 %v378_v28, %v179_v37 }
  0xbd   :  { %v184_v43 = vsel %vm183_vm7, %v378_v28, %v180_v40 }
  0xbe   :  { %v189_v44 = vsel %vm186_vm8, %v188_v41, %v184_v43 }
  0xbf   :  { %v190_v45 = vmul.f32 %v189_v44, %v120_v15 }
  0xc1   :  { %v192_v48 = vmul.f32 %v190_v45, %v150_v46 }
  0xc3   :  { %v193_v49 = vpack.c.bf16 %v192_v48, %v191_v47 }
  0xc5   :  { %266 = vmatmul.bf16.vlgmr.msra.gmra.mxu2 %v193_v49 }
 0x148   :  { %v267_v50 = vpop.f32.mrf.mxu2 }
 0x149   :  { %272 = vst [vmem:[#allocation10] sm:$0xff] %v267_v50 }
 0x150   :  { %v269_v51 = vpop.f32.mrf.mxu2 }
 0x151   :  { %273 = vst [vmem:[#allocation10 + $0x8] sm:$0xff] %v269_v51 }
 0x152   :  { %286 = dma.vmem_to_hbm [thread:$0]  %s279_s3, 256, %s281_s11, [#allocation4], %s514_s12, %s514_s12, %s515_s13  }
 0x153   :  { %505 = dma.done.wait [#allocation4], 256  }
 0x154   :  { %506 = vsyncadd [#allocation4], 4294967040 }
 0x155   :  { %291 = vsyncpa [#allocation3], 1 }
 0x156   :  { %292 = vsyncpa [#allocation6], 1 }
 0x157   :  { %293 = vsyncpa [#allocation9], 1 }
 0x158   :  { %294 = vsyncpa [#allocation4], 1 }

</bundles_post_ra>
